<compile_context>
chip_gen: v6e
topology: v6e:2x2x1
jax: 0.10.0
libtpu: 0.0.40
codegen_flags: <defaults>
</compile_context>

<pallas_src>
import jax
import jax.numpy as jnp
from jax.experimental import pallas as pl
from jax.experimental.pallas import tpu as pltpu


def _round_up(v, m):
    return ((v + m - 1) // m) * m


def patch_embed_kernel(p_ref, w_ref, pos_ref, o_ref):
    # p_ref:   (tm, Kp)  patch rows for this row tile (row 0 of batch = zeros -> cls)
    # w_ref:   (Kp, Ep)  projection weight (grid-invariant; conv bias folded into pos)
    # pos_ref: (tm, Ep)  f32 additive rows: pos_embed (+ conv bias), cls+pos for row 0
    # o_ref:   (tm, Ep)  output rows (lane/sublane aligned, unmasked stores)
    acc = jnp.dot(p_ref[...], w_ref[...], preferred_element_type=jnp.float32)
    o_ref[...] = (acc + pos_ref[...].astype(jnp.float32)).astype(o_ref.dtype)


def patch_embedding(x, conv_w, conv_b, cls_token, pos_embed, patch_size,
                    *, token_tile=256, compute_dtype=jnp.bfloat16):
    """x: [B, C, H, W] (NCHW). Returns [B, N+1, E] (cls token first)."""
    B, C, H, W = x.shape
    P = patch_size
    E = conv_w.shape[0]
    nh, nw = H // P, W // P
    N = nh * nw
    K = C * P * P
    Ntot = N + 1                      # cls + tokens
    out_dtype = x.dtype
    if compute_dtype is None:
        compute_dtype = jnp.float32

    # ---- glue: patchify (matches Conv2d stride=P, kernel=P input gathering) ----
    # Cast to compute dtype FIRST so the transpose moves half the bytes (bf16).
    # [B, C, nh, P, nw, P] -> [B, nh, nw, C, P, P] -> [B, N, K]
    # TODO(synk): move this gather into the kernel (DMA (1, C, P, W) row strips
    # from HBM via memory_space=pl.ANY) or accept NHWC upstream so the largest
    # tensor is not round-tripped through HBM by this transpose.
    xc = x.astype(compute_dtype)
    patches = xc.reshape(B, C, nh, P, nw, P)
    patches = patches.transpose(0, 2, 4, 1, 3, 5).reshape(B, N, K)

    # Conv2d weight [E, C, P, P] -> matmul weight [K, E]
    w_mat = conv_w.reshape(E, K).T

    pos = pos_embed.reshape(Ntot, E).astype(jnp.float32)
    # Fold conv bias into the per-token additive rows; the cls row (row 0) is
    # produced by a zero patch row, so it gets cls_token + pos_embed[0] (no bias).
    cls_row = cls_token.reshape(1, E).astype(jnp.float32) + pos[0:1]      # (1, E)
    pos_full = jnp.concatenate([cls_row, pos[1:] + conv_b.astype(jnp.float32)],
                               axis=0)                                    # (Ntot, E)

    # ---- tiling / padding: lane-dense last dims, MXU-aligned row tiles ----
    Kp = _round_up(K, 128)
    Ep = _round_up(E, 128)
    row_align = 128 if Ntot >= 128 else 16          # 128 for MXU cadence, 16 = bf16 pack
    tm = _round_up(min(token_tile, Ntot), row_align)
    Np_tot = _round_up(Ntot, tm)                    # padded rows per batch (incl. cls)
    T = Np_tot // tm                                # row tiles per batch element

    # One pad does everything: 1 leading zero row (cls), trailing row padding,
    # trailing K padding.  Guarded no-op pads where possible.
    patches = jnp.pad(patches, ((0, 0), (1, Np_tot - Ntot), (0, Kp - K)))
    patches = patches.reshape(B * Np_tot, Kp)

    w_p = w_mat.astype(compute_dtype)
    if Kp != K or Ep != E:
        w_p = jnp.pad(w_p, ((0, Kp - K), (0, Ep - E)))

    pos_p = pos_full
    if Np_tot != Ntot or Ep != E:
        pos_p = jnp.pad(pos_p, ((0, Np_tot - Ntot), (0, Ep - E)))

    # ---- VMEM budget: actual double-buffered need, capped for v7x (64 MiB) ----
    cbytes = jnp.dtype(compute_dtype).itemsize
    obytes = jnp.dtype(out_dtype).itemsize
    need = (2 * tm * Kp * cbytes        # patches stream (double-buffered)
            + 2 * Kp * Ep * cbytes      # weight (resident; default 2 buffers)
            + 2 * tm * Ep * 4           # pos rows (f32)
            + 2 * tm * Ep * obytes)     # output tiles
    vmem_limit = int(min(max(2 * need, 4 << 20), 32 << 20))
    vmem_limit = int(max(vmem_limit, need + (2 << 20)))
    # TODO(synk): for very large Kp*Ep (e.g. patch_size=32) add a K grid axis
    # with an f32 VMEM accumulator (init/finalize via pl.when) instead of
    # holding all of Kp per step.
    # TODO(synk): pipeline_mode=pl.Buffered(1) on the weight spec would save one
    # resident weight copy (helps v7x's 64 MiB VMEM) once single-buffer
    # pipelining is robust in this JAX version.

    cost = pl.CostEstimate(
        flops=int(2 * B * Np_tot * Kp * Ep),
        transcendentals=0,
        bytes_accessed=int(B * Np_tot * Kp * cbytes + Kp * Ep * cbytes
                           + B * Np_tot * Ep * 4 + B * Np_tot * Ep * obytes),
    )

    # Flattened single parallel grid axis over B*T row tiles (lets v7x's two
    # TensorCores split at row-tile granularity; harmless on v5e/v6e).
    out = pl.pallas_call(
        patch_embed_kernel,
        out_shape=jax.ShapeDtypeStruct((B * Np_tot, Ep), out_dtype),
        grid_spec=pltpu.PrefetchScalarGridSpec(
            num_scalar_prefetch=0,
            grid=(B * T,),
            in_specs=[
                pl.BlockSpec((tm, Kp), lambda i: (i, 0)),        # patch rows
                pl.BlockSpec((Kp, Ep), lambda i: (0, 0)),        # weight: invariant
                pl.BlockSpec((tm, Ep), lambda i: (i % T, 0)),    # pos: batch-invariant
            ],
            out_specs=pl.BlockSpec((tm, Ep), lambda i: (i, 0)),
        ),
        compiler_params=pltpu.CompilerParams(
            dimension_semantics=("parallel",),
            vmem_limit_bytes=vmem_limit,
            allow_input_fusion=[True, True, True],
        ),
        cost_estimate=cost,
    )(patches, w_p, pos_p)

    # Kernel already wrote the final [cls, tokens] layout; slice off padding only.
    return out.reshape(B, Np_tot, Ep)[:, :Ntot, :E]


if __name__ == "__main__":
    # Small, consistent shapes: in_channels=4, patch_size=4, emb_size=32,
    # img 16x16 -> N = 16 patches, sequence length 17, batch 2.
    B, C, H, W = 2, 4, 16, 16
    P, E = 4, 32
    N = (H // P) * (W // P)

    key = jax.random.PRNGKey(0)
    k_x, k_w, k_b, k_cls, k_pos = jax.random.split(key, 5)

    x = jax.random.normal(k_x, (B, C, H, W), dtype=jnp.float32)
    conv_w = jax.random.normal(k_w, (E, C, P, P), dtype=jnp.float32) * 0.02
    conv_b = jax.random.normal(k_b, (E,), dtype=jnp.float32) * 0.02
    cls_token = jax.random.normal(k_cls, (1, 1, E), dtype=jnp.float32)
    pos_embed = jax.random.normal(k_pos, (1, N + 1, E), dtype=jnp.float32)

    out = patch_embedding(x, conv_w, conv_b, cls_token, pos_embed, P)
    out = jax.block_until_ready(out)

    # Pure-JAX references: full-f32 math (loose tol, since kernel computes the
    # GEMM in bf16) and a bf16-input / f32-accumulate reference (tight tol).
    patches_ref = x.reshape(B, C, H // P, P, W // P, P)
    patches_ref = patches_ref.transpose(0, 2, 4, 1, 3, 5).reshape(B, N, C * P * P)
    w_mat_ref = conv_w.reshape(E, -1).T

    proj_f32 = patches_ref @ w_mat_ref + conv_b
    cls_b = jnp.broadcast_to(cls_token, (B, 1, E))
    ref_f32 = jnp.concatenate([cls_b, proj_f32], axis=1) + pos_embed

    proj_bf = jnp.dot(patches_ref.astype(jnp.bfloat16),
                      w_mat_ref.astype(jnp.bfloat16),
                      preferred_element_type=jnp.float32) + conv_b
    ref_bf = jnp.concatenate([cls_b, proj_bf], axis=1) + pos_embed

    assert out.shape == (B, N + 1, E), out.shape
    assert out.dtype == x.dtype, out.dtype
    assert jnp.allclose(out, ref_bf, atol=1e-4, rtol=1e-4)   # same quantization path
    assert jnp.allclose(out, ref_f32, atol=5e-2, rtol=5e-2)  # bf16-vs-f32 tolerance
    print("KERNEL_OK")
</pallas_src>

<mosaic_0001>
module attributes {stable_mosaic.version = 11 : i64} {
  func.func @patch_embed_kernel(%arg0: i32, %arg1: memref<32x128xbf16, #tpu.memory_space<vmem>>, %arg2: memref<128x128xbf16, #tpu.memory_space<vmem>>, %arg3: memref<32x128xf32, #tpu.memory_space<vmem>>, %arg4: memref<32x128xf32, #tpu.memory_space<vmem>>) attributes {dimension_semantics = [#tpu.dimension_semantics<parallel>], iteration_bounds = array<i64: 2>, scalar_prefetch = 0 : i64, scratch_operands = 0 : i64, tpu.core_type = #tpu.core_type<tc>, window_params = [{transform_indices = @transform_0, window_bounds = array<i64: 32, 128>}, {pipeline_mode = #tpu.pipeline_mode<synchronous>, transform_indices = @transform_1, window_bounds = array<i64: 128, 128>}, {transform_indices = @transform_2, window_bounds = array<i64: 32, 128>}, {transform_indices = @transform_3, window_bounds = array<i64: 32, 128>}]} {
    %c0 = arith.constant 0 : index
    %c0_0 = arith.constant 0 : index
    %0 = vector.load %arg1[%c0, %c0_0] : memref<32x128xbf16, #tpu.memory_space<vmem>>, vector<32x128xbf16>
    %c0_1 = arith.constant 0 : index
    %c0_2 = arith.constant 0 : index
    %1 = vector.load %arg2[%c0_1, %c0_2] : memref<128x128xbf16, #tpu.memory_space<vmem>>, vector<128x128xbf16>
    %cst = arith.constant dense<0.000000e+00> : vector<32x128xf32>
    %2 = tpu.matmul %0, %1, %cst {dimension_numbers = #tpu.dot_dimension_numbers<[1], [0], [0], [1], [0, 0, 1, 1], [], []>} : vector<32x128xbf16>, vector<128x128xbf16>, vector<32x128xf32> -> vector<32x128xf32>
    %c0_3 = arith.constant 0 : index
    %c0_4 = arith.constant 0 : index
    %3 = vector.load %arg3[%c0_3, %c0_4] : memref<32x128xf32, #tpu.memory_space<vmem>>, vector<32x128xf32>
    %4 = arith.addf %2, %3 : vector<32x128xf32>
    %c0_5 = arith.constant 0 : index
    %c0_6 = arith.constant 0 : index
    %5 = vector.load %arg4[%c0_5, %c0_6] : memref<32x128xf32, #tpu.memory_space<vmem>>, vector<32x128xf32>
    tpu.vector_store %arg4[%c0_5, %c0_6], %4 {strides = array<i32>} : memref<32x128xf32, #tpu.memory_space<vmem>>, vector<32x128xf32>,
    return
  }
  func.func @transform_0(%arg0: i32) -> (i32, i32) {
    %c0_i32 = arith.constant 0 : i32
    %c0_i32_0 = arith.constant 0 : i32
    return %arg0, %c0_i32 : i32, i32
  }
  func.func @transform_1(%arg0: i32) -> (i32, i32) {
    %c0_i32 = arith.constant 0 : i32
    %c0_i32_0 = arith.constant 0 : i32
    %c0_i32_1 = arith.constant 0 : i32
    return %c0_i32, %c0_i32_0 : i32, i32
  }
  func.func @transform_2(%arg0: i32) -> (i32, i32) {
    %c1_i32 = arith.constant 1 : i32
    %c0_i32 = arith.constant 0 : i32
    %0 = arith.cmpi eq, %c1_i32, %c0_i32 : i32
    %c1_i32_0 = arith.constant 1 : i32
    %1 = arith.select %0, %c1_i32_0, %c1_i32 : i32
    %2 = arith.remsi %arg0, %1 : i32
    %c0_i32_1 = arith.constant 0 : i32
    %3 = arith.cmpi ne, %2, %c0_i32_1 : i32
    %c0_i32_2 = arith.constant 0 : i32
    %4 = arith.cmpi slt, %2, %c0_i32_2 : i32
    %c0_i32_3 = arith.constant 0 : i32
    %5 = arith.cmpi slt, %1, %c0_i32_3 : i32
    %6 = arith.xori %4, %5 : i1
    %7 = arith.andi %6, %3 : i1
    %8 = arith.addi %2, %1 : i32
    %9 = arith.select %7, %8, %2 : i32
    %c0_i32_4 = arith.constant 0 : i32
    %c0_i32_5 = arith.constant 0 : i32
    return %9, %c0_i32_4 : i32, i32
  }
  func.func @transform_3(%arg0: i32) -> (i32, i32) {
    %c0_i32 = arith.constant 0 : i32
    %c0_i32_0 = arith.constant 0 : i32
    return %arg0, %c0_i32 : i32, i32
  }
}

</mosaic_0001>

<bundles_post_ra>
// kernel: tpu_custom_call.1
= control target key start
LH: loop header
LB: loop body
LE: loop exit
PB: predicated region body
PF: predicated region fallthrough
CT: control target
= control target key end

     0   :  { %8 = vsyncpa [#allocation3], 0  ;;  %s982_s0 = inlined_call_operand.hbm [shape: bf16[64,128], index: 0, kind: input, shape index: {}]   ;;  %s983_s1 = inlined_call_operand.hbm [shape: bf16[128,128], index: 1, kind: input, shape index: {}]   ;;  %s984_s2 = inlined_call_operand.hbm [shape: f32[32,128], index: 2, kind: input, shape index: {}]   ;;  %s985_s3 = inlined_call_operand.hbm [shape: f32[64,128], index: 3, kind: output, shape index: {}]  }
   0x1   :  { %10 = vsyncpa [#allocation3 + $0x1], 0 }
   0x2   :  { %11 = vsyncpa [#allocation6], 0 }
   0x3   :  { %12 = vsyncpa [#allocation4], 0 }
   0x4   :  { %14 = vsyncpa [#allocation4 + $0x1], 0  ;;  %s787_s12 = smov 0   ;;  %s789_s13 = smov 0  }
   0x5   :  { %s791_s14 = smov 0   ;;  %s793_s15 = smov 0  }
   0x6 LB: > { %s808_s16 = sadd.s32 4294967295, %s755_s15   ;;  %s464_s17 = sadd.s32 4294967294, %s755_s15   ;;  %s755_s15 = sphi %s793_s15, %s1006_s15   ;;  %s751_s14 = sphi %s791_s14, %s1005_s14   ;;  %s747_s13 = sphi %s789_s13, %s1004_s13   ;;  %s743_s12 = sphi %s787_s12, %s1003_s12  }
   0x7   : > { %p40_p0 = scmp.ne.s32.totalorder %s747_s13, %s743_s12  ;;  %p986_p1 = scmp.eq.s32.totalorder %s808_s16, 0 }
   0x8   : > { %p106_p2 = scmp.eq.s32.totalorder %s808_s16, 1  ;;  %p112_p3 = scmp.eq.s32.totalorder %s464_s17, 1 }
   0x9   : > { %p817_p4 = por %p986_p1, %p40_p0  ;;  %p465_p5 = scmp.ge.s32.totalorder %s755_s15, 1 }
   0xa   : > { %p822_p6 = por %p112_p3, %p40_p0  ;;  %p119_p7 = scmp.lt.s32.totalorder %s755_s15, 3 }
   0xb   : > { %s990_s18 = scalar_select %p817_p4, 1, 0 }
   0xc   : > { %s991_s19 = scalar_select %p822_p6, 1, 0 }
   0xd   : > { %p827_p8 = pnand %p465_p5, %p119_p7  ;;  %s757_s21 = smov [#allocation5]  }
   0xe   : > { %s131_s22 = sshll.u32 %s757_s21, 4  ;;  %s758_s24 = smov [#allocation7]   ;;  %s132_s22 = int_to_ptr.vmem [resolvable:$true] %s131_s22 }
   0xf   : > { %s992_s20 = scalar_select %p827_p8, 1, 0 }
  0x10   : > { %p536_p9 = pneg %p827_p8  ;;  %s144_s25 = sshll.u32 %s758_s24, 4  ;;  %s145_s25 = int_to_ptr.vmem [resolvable:$true] %s144_s25 }
  0x11   : > { %s618_s26 = scalar_lea.vmem %s132_s22, 1024  ;;  %p626_p5 = scmp.lt.s32.totalorder %s132_s22, %s132_s22 }
  0x12   : > { %p836_p11 = pnand %p536_p9, %p986_p1  ;;  %p619_p13 = scmp.ne.s32.totalorder %s132_s22, %s618_s26 }
  0x13   : > { %p627_p7 = scmp.lt.s32.totalorder %s618_s26, %s618_s26 }
  0x14   : > { %p609_p12 = pneg %p836_p11 }
  0x15   : > { %p628_p10 = por %p627_p7, %p626_p5 }
  0x16   : > { %p621_p0 = pnand %p619_p13, %p609_p12 }
  0x18   : > { %p622_p3 = pneg %p621_p0 }
  0x1a   : > { %p629_p9 = pnand %p628_p10, %p622_p3 }
  0x1c   : > { %632 = shalt.err (!%p629_p9)
}
  0x1d   : > { %s759_s27 = smov 64   ;;  %s760_s28 = smov 4  }
  0x1e   : > { %539 = dma.hbm_to_vmem [thread:$0]  (!%p836_p11), %s983_s1, 1024, %s132_s22, [#allocation6], %s759_s27, %s759_s27, %s760_s28  }
  0x1f   : > { %s644_s4 = scalar_lea.vmem %s145_s25, 512  ;;  %p652_p10 = scmp.lt.s32.totalorder %s145_s25, %s145_s25 }
  0x20   : > { %p645_p13 = scmp.ne.s32.totalorder %s145_s25, %s644_s4  ;;  %p653_p3 = scmp.lt.s32.totalorder %s644_s4, %s644_s4 }
  0x22   : > { %p647_p0 = pnand %p645_p13, %p609_p12  ;;  %p654_p7 = por %p653_p3, %p652_p10 }
  0x24   : > { %p648_p5 = pneg %p647_p0 }
  0x26   : > { %p655_p9 = pnand %p654_p7, %p648_p5 }
  0x28   : > { %658 = shalt.err (!%p655_p9)
}
  0x29   : > { %s761_s5 = smov 128   ;;  %s762_s6 = smov 8  }
  0x2a   : > { %542 = dma.hbm_to_vmem [thread:$0]  (!%p836_p11), %s984_s2, 512, %s145_s25, [#allocation6], %s761_s5, %s761_s5, %s762_s6  }
  0x2b   : > { %s862_s9 = sadd.s32 1, %s755_s15   ;;  %s27_s11 = sadd.s32 1, %s751_s14 }
  0x2c   : > { %s24_s10 = ssub.s32 %s755_s15, %s862_s9  ;;  %p34_p13 = scmp.ne.s32.totalorder %s751_s14, %s747_s13 }
  0x2d   : > { %p25_p12 = scmp.eq.s32.totalorder %s24_s10, 0  ;;  %p35_p0 = scmp.eq.s32.totalorder %s755_s15, 0 }
  0x2e   : > { %p875_p10 = por %p106_p2, %p34_p13  ;;  %p553_p3 = scmp.lt.s32.totalorder %s755_s15, 2 }
  0x2f   : > { %s871_s17 = scalar_select %p25_p12, %s751_s14, %s27_s11  }
  0x30   : > { %p36_p5 = por %p35_p0, %p34_p13  ;;  %s158_s22 = sand.u32 1, %s751_s14  }
  0x31   : > { %s994_s21 = scalar_select %p875_p10, 1, 0 }
  0x32   : > { %s469_s23 = sshll.u32 %s158_s22, 4  ;;  %s492_s24 = sshll.u32 %s755_s15, 8 }
  0x33   : > { %s885_s29 = scalar_lea.hbm %s982_s0, %s492_s24  ;;  %s162_s30 = scalar_lea.vmem [#allocation2], %s469_s23 }
  0x34   : > { %s169_s4 = sshll.u32 %s162_s30, 4  ;;  %p889_p2 = pnand %p553_p3, %p36_p5  ;;  %s887_s4 = int_to_ptr.vmem [resolvable:$true] %s169_s4 }
  0x35   : > { %s893_s6 = scalar_lea.sflag [#allocation3], %s158_s22  ;;  %s659_s7 = scalar_lea.hbm %s885_s29, 256 }
  0x36   : > { %p660_p11 = scmp.ne.s32.totalorder %s885_s29, %s659_s7  ;;  %p661_p7 = pneg %p889_p2 }
  0x37   : > { %s664_s11 = scalar_lea.hbm %s982_s0, 512  ;;  %p665_p13 = scmp.lt.s32.totalorder %s885_s29, %s982_s0 }
  0x38   : > { %p662_p9 = pnand %p661_p7, %p660_p11  ;;  %p666_p0 = scmp.lt.s32.totalorder %s664_s11, %s659_s7 }
  0x3a   : > { %p663_p12 = pneg %p662_p9  ;;  %p667_p5 = por %p666_p0, %p665_p13 }
  0x3c   : > { %p668_p3 = pnand %p667_p5, %p663_p12 }
  0x3e   : > { %671 = shalt.err (!%p668_p3)
}
  0x3f   : > { %s672_s22 = scalar_lea.vmem %s887_s4, 256  ;;  %s763_s25 = smov [#allocation2]  }
  0x40   : > { %p673_p1 = scmp.ne.s32.totalorder %s887_s4, %s672_s22  ;;  %s677_s26 = sshll.u32 %s763_s25, 4  ;;  %s678_s26 = int_to_ptr.vmem [resolvable:$false] %s677_s26 }
  0x41   : > { %s679_s30 = scalar_lea.vmem %s678_s26, 512  ;;  %p680_p9 = scmp.lt.s32.totalorder %s887_s4, %s678_s26 }
  0x42   : > { %p675_p6 = pnand %p673_p1, %p661_p7  ;;  %p681_p10 = scmp.lt.s32.totalorder %s679_s30, %s672_s22 }
  0x44   : > { %p676_p11 = pneg %p675_p6  ;;  %p682_p4 = por %p681_p10, %p680_p9 }
  0x46   : > { %p683_p8 = pnand %p682_p4, %p676_p11 }
  0x48   : > { %686 = shalt.err (!%p683_p8)
}
  0x49   : > { %546 = dma.hbm_to_vmem [thread:$0]  (!%p889_p2), %s885_s29, 256, %s887_s4, %s893_s6, %s759_s27, %s759_s27, %s760_s28  }
  0x4a   : > { %p996_p1 = scmp.ne.s32.totalorder %s992_s20, 0 }
  0x4b   : > { %s920_s7 = sand.u32 (!%p996_p1), 1, %s747_s13   ;;  %p997_p4 = scmp.ne.s32.totalorder (!%p996_p1), %s990_s18, 0 }
  0x4c   : > { %181 = sbr.rel (%p996_p1) target bundleno = 333 (0x14d), region = 32  ;;  %s473_s8 = sshll.u32 (!%p996_p1), %s920_s7, 4 }
  0x4d   : > { %s184_s10 = scalar_lea.sflag (!%p996_p1), [#allocation3], %s920_s7  ;;  %s187_s11 = scalar_lea.vmem (!%p996_p1), [#allocation2], %s473_s8 }
  0x51   : > { %730 = dma.done.wait (%p997_p4), %s184_s10, 256  }
  0x52   : > { %732 = vsyncadd (%p997_p4), %s184_s10, 4294967040  ;;  %p998_p6 = scmp.eq.s32.totalorder %s808_s16, 0 }
  0x54   : > { %734 = dma.done.wait (%p998_p6), [#allocation6], 1536   ;;  %p999_p8 = pmov %p998_p6 }
  0x55   : > { %v597_v0 = vld [vmem:[#allocation5 + $0x38] sm:$0xff]   ;;  %v598_v1 = vld [vmem:[#allocation5 + $0x30] sm:$0xff]   ;;  %v599_v2 = vld [vmem:[#allocation5 + $0x28] sm:$0xff]   ;;  %s476_s18 = sshll.u32 %s920_s7, 5  ;;  %s493_s28 = sshll.u32 %s808_s16, 9 }
  0x56   : > { %736 = vsyncadd (%p999_p8), [#allocation6], 4294965760  ;;  %504 = vmatprep.subr.bf16.mxu0 %v597_v0  ;;  %v600_v3 = vld [vmem:[#allocation5 + $0x20] sm:$0xff]   ;;  %v601_v5 = vld [vmem:[#allocation5 + $0x18] sm:$0xff]   ;;  %s217_s20 = scalar_lea.vmem [#allocation8], %s476_s18  ;;  %s939_s5 = scalar_lea.hbm %s985_s3, %s493_s28 }
  0x57   : > { %505 = vmatpush3.bf16.msra.mxu0 %v597_v0  ;;  %v605_v4 = vld [vmem:[%s187_s11] sm:$0xff]   ;;  %v603_v7 = vld [vmem:[#allocation5 + $0x8] sm:$0xff]   ;;  %s372_s27 = sshll.u32 %s217_s20, 4  ;;  %v244_v15 = vld [vmem:[#allocation7 + $0x18] sm:$0xff]  ;;  %s359_s6 = scalar_lea.sflag [#allocation4], %s920_s7  ;;  %s934_s27 = int_to_ptr.vmem [resolvable:$true] %s372_s27 }
  0x58   : > { %506 = vmatprep.subr.bf16.mxu0 %v598_v1  ;;  %520 = vmatprep.mubr.bf16.mxu0 %v605_v4  ;;  %v602_v6 = vld [vmem:[#allocation5 + $0x10] sm:$0xff]   ;;  %v604_v8 = vld [vmem:[#allocation5] sm:$0xff]   ;;  %v606_v9 = vld [vmem:[%s187_s11 + $0x8] sm:$0xff]   ;;  %s687_s16 = scalar_lea.vmem %s934_s27, 512  ;;  %p1000_p2 = scmp.ne.s32.totalorder %s994_s21, 0 }
  0x59   : > { %v243_v10 = vld [vmem:[#allocation7 + $0x10] sm:$0xff]  ;;  %v241_v12 = vld [vmem:[#allocation7] sm:$0xff]  ;;  %v242_v18 = vld [vmem:[#allocation7 + $0x8] sm:$0xff]  ;;  %p688_p10 = scmp.ne.s32.totalorder %s934_s27, %s687_s16  ;;  %s764_s23 = smov [#allocation8]  }
  0x5a   : > { %s691_s24 = sshll.u32 %s764_s23, 4  ;;  %s692_s24 = int_to_ptr.vmem [resolvable:$false] %s691_s24 }
  0x5b   : > { %507 = vmatpush3.bf16.msra.mxu0 %v598_v1  ;;  %p689_p7 = pnand %p688_p10, %p1000_p2  ;;  %s693_s22 = scalar_lea.vmem %s692_s24, 1024 }
  0x5c   : > { %508 = vmatprep.subr.bf16.mxu0 %v599_v2  ;;  %p694_p13 = scmp.lt.s32.totalorder %s934_s27, %s692_s24  ;;  %p695_p0 = scmp.lt.s32.totalorder %s693_s22, %s687_s16 }
  0x5d   : > { %p690_p12 = pneg %p689_p7 }
  0x5e   : > { %p696_p5 = por %p695_p0, %p694_p13 }
  0x5f   : > { %509 = vmatpush3.bf16.msra.mxu0 %v599_v2 }
  0x60   : > { %510 = vmatprep.subr.bf16.mxu0 %v600_v3  ;;  %p697_p3 = pnand %p696_p5, %p690_p12 }
  0x63   : > { %511 = vmatpush3.bf16.msra.mxu0 %v600_v3 }
  0x64   : > { %512 = vmatprep.subr.bf16.mxu0 %v601_v5 }
  0x67   : > { %513 = vmatpush3.bf16.msra.mxu0 %v601_v5 }
  0x68   : > { %514 = vmatprep.subr.bf16.mxu0 %v602_v6 }
  0x6b   : > { %515 = vmatpush3.bf16.msra.mxu0 %v602_v6 }
  0x6c   : > { %516 = vmatprep.subr.bf16.mxu0 %v603_v7 }
  0x6f   : > { %517 = vmatpush3.bf16.msra.mxu0 %v603_v7 }
  0x70   : > { %518 = vmatprep.subr.bf16.mxu0 %v604_v8 }
  0x73   : > { %519 = vmatpush3.bf16.msra.mxu0 %v604_v8 }
  0x76   : > { %521 = vmatmul.mubr.bf16.vlgmr.msra.gmra.mxu0 %v606_v9 }
 0x136   : > { %v522_v11 = vpop.f32.mrf.mxu0 }
 0x137   : > { %v348_v13 = vadd.f32 %v522_v11, %v243_v10 }
 0x138   : > { %v339_v14 = vpop.f32.mrf.mxu0 }
 0x139   : > { %356 = vst [vmem:[%s217_s20 + $0x10] sm:$0xff] %v348_v13  ;;  %v340_v16 = vadd.f32 %v339_v14, %v241_v12 }
 0x13a   : > { %v523_v17 = vpop.f32.mrf.mxu0 }
 0x13b   : > { %354 = vst [vmem:[%s217_s20] sm:$0xff] %v340_v16  ;;  %v351_v19 = vadd.f32 %v523_v17, %v244_v15 }
 0x13c   : > { %v342_v20 = vpop.f32.mrf.mxu0 }
 0x13d   : > { %357 = vst [vmem:[%s217_s20 + $0x18] sm:$0xff] %v351_v19  ;;  %v343_v21 = vadd.f32 %v342_v20, %v242_v18 }
 0x13f   : > { %355 = vst [vmem:[%s217_s20 + $0x8] sm:$0xff] %v343_v21 }
 0x140   : > { %700 = shalt.err (!%p697_p3)
}
 0x141   : > { %s701_s25 = scalar_lea.hbm %s939_s5, 512  ;;  %s705_s8 = scalar_lea.hbm %s985_s3, 1024 }
 0x142   : > { %p702_p11 = scmp.ne.s32.totalorder %s939_s5, %s701_s25  ;;  %p706_p4 = scmp.lt.s32.totalorder %s939_s5, %s985_s3 }
 0x143   : > { %p707_p6 = scmp.lt.s32.totalorder %s705_s8, %s701_s25 }
 0x144   : > { %p703_p9 = pnand %p702_p11, %p1000_p2 }
 0x145   : > { %p708_p8 = por %p707_p6, %p706_p4 }
 0x146   : > { %p704_p1 = pneg %p703_p9 }
 0x148   : > { %p709_p10 = pnand %p708_p8, %p704_p1 }
 0x14a   : > { %712 = shalt.err (!%p709_p10)
}
 0x14b   : > { %s765_s18 = smov 128   ;;  %s766_s20 = smov 8  }
 0x14c   : > { %534 = dma.vmem_to_hbm [thread:$0]  (%p1000_p2), %s934_s27, 512, %s939_s5, %s359_s6, %s765_s18, %s765_s18, %s766_s20  }
 0x14d PF: > { %s387_s28 = sand.u32 1, %s743_s12   ;;  %p1001_p7 = scmp.ne.s32.totalorder %s991_s19, 0 }
 0x14e   : > { %p1002_p12 = scmp.ge.s32.totalorder %s755_s15, 2  ;;  %s388_s29 = scalar_lea.sflag [#allocation4], %s387_s28 }
 0x150   : > { %p548_p13 = pnand %p1002_p12, %p1001_p7 }
 0x152   : > { %p549_p0 = pneg %p548_p13 }
 0x154   : > { %738 = dma.done.wait (%p549_p0), %s388_s29, 512  }
 0x155   : > { %740 = vsyncadd (%p549_p0), %s388_s29, 4294966784  ;;  %p17_p5 = scmp.ge.s32.totalorder %s862_s9, 4   ;;  %s1003_s12 = smov %s747_s13 }
 0x156   : > { %s1004_s13 = smov %s751_s14  ;;  %s1005_s14 = smov %s871_s17 }
 0x157   : > { %s1006_s15 = smov %s862_s9  ;;  %19 = sbr.rel (!%p17_p5) target bundleno = 6 (0x6), region = 85 }
 0x15c   :  { %393 = vsyncpa [#allocation3], 1 }
 0x15d   :  { %395 = vsyncpa [#allocation3 + $0x1], 1 }
 0x15e   :  { %396 = vsyncpa [#allocation6], 1 }
 0x15f   :  { %397 = vsyncpa [#allocation4], 1 }
 0x160   :  { %399 = vsyncpa [#allocation4 + $0x1], 1 }

</bundles_post_ra>
